<compile_context>
chip_gen: v5e
topology: v5e:2x2
jax: 0.10.0
libtpu: 0.0.40
codegen_flags: <defaults>
</compile_context>

<pallas_src>
import functools

import jax
import jax.numpy as jnp
from jax import lax
from jax.experimental import pallas as pl
from jax.experimental.pallas import tpu as pltpu


def _round_up(n, m):
    return ((n + m - 1) // m) * m


def _cdiv(a, b):
    return -(-a // b)


def _recurrent_scaled_grid_kernel(x_ref, wh_ref, wi_ref, bh_ref, h0_ref,
                                  wo_ref, bo_ref, out_ref, *,
                                  num_layers, interleave, mxu_dtype,
                                  unroll_limit=8):
    """One batch tile of the full RecurrentScaledGrid forward, VMEM-resident.

    x_ref  : (TB, Hp)  float32   lane-padded input (D_in == H)
    wh_ref : (Hp, Hp)  float32   pre-transposed, scalar-folded, lane-padded Wh
    wi_ref : (1, Hp)   float32   diag(Wi) * scalar (diagMask == identity)
    bh_ref : (1, Hp)   float32   bh * scalar
    h0_ref : (1, Hp)   float32   u0 @ Wh^T for u0 = -1, precomputed in the wrapper
    wo_ref : (Hp, Dp)  float32   pre-transposed + lane-padded output weight
    bo_ref : (1, Dp)   float32   lane-padded output bias
    out_ref: (TB, Dp)  float32
    """
    x = x_ref[...]                                   # (TB, Hp)
    wh = wh_ref[...].astype(mxu_dtype)               # hoisted cast (bf16 path on v6e/v7x)

    # Loop-invariant input projection: diagonal Wi -> elementwise VPU multiply, no MXU.
    xc = x * wi_ref[...] + bh_ref[...]               # (TB, Hp)

    # Step 0: u0 = -ones -> contribution precomputed on host; pure VPU + EUP.
    u = jnp.tanh(h0_ref[...] + xc)                   # (TB, Hp)

    def step(u_local, xc_local):
        v = jnp.dot(u_local.astype(mxu_dtype), wh,
                    preferred_element_type=jnp.float32)
        return jnp.tanh(v + xc_local)

    def head(u_local):
        y = jnp.dot(u_local, wo_ref[...],
                    preferred_element_type=jnp.float32) + bo_ref[...]
        return jnp.maximum(y, 0.0).astype(out_ref.dtype)

    if interleave:
        # Two independent batch sub-tiles: the MXU pushes one half while the EUP
        # runs tanh on the other, hiding the serial per-layer latency.
        half = x.shape[0] // 2
        u1, u2 = u[:half], u[half:]
        xc1, xc2 = xc[:half], xc[half:]
        if num_layers - 1 <= unroll_limit:
            for _ in range(1, num_layers):
                u1 = step(u1, xc1)
                u2 = step(u2, xc2)
        else:
            def body(_, carry):
                a, b = carry
                return (step(a, xc1), step(b, xc2))
            u1, u2 = lax.fori_loop(1, num_layers, body, (u1, u2), unroll=2)
        out_ref[pl.ds(0, half), :] = head(u1)
        out_ref[pl.ds(half, half), :] = head(u2)
    else:
        if num_layers - 1 <= unroll_limit:
            for _ in range(1, num_layers):
                u = step(u, xc)
        else:
            u = lax.fori_loop(1, num_layers, lambda _, uu: step(uu, xc), u,
                              unroll=2)
        out_ref[...] = head(u)


def recurrent_scaled_grid_forward(x, params, *, batch_tile=256,
                                  mxu_dtype=jnp.float32):
    """x: (B, H) float32. params: dict produced by init_params."""
    wh_t = params["wh_t"]        # (H, H)   u @ wh_t == u @ Wh^T
    bh = params["bh"]            # (1, H)
    wi_diag = params["wi_diag"]  # (1, H)   diag of the (identity-masked) inputWeight
    scalar = params["scalar"]    # (1, 1)
    wo_t = params["wo_t"]        # (H, D_out)
    bo = params["bo"]            # (1, D_out)
    num_layers = int(params["layers"])
    assert num_layers >= 1

    B, D_in = x.shape
    H = wh_t.shape[0]
    D_out = wo_t.shape[-1]
    # diagMask is (H, H) applied to inputWeight.weight (H, D_in) => D_in == H.
    assert D_in == H, "diagonal-Wi formulation requires D_in == H"

    # Fold the learned scalar into the weights (forward-only transform).
    s = scalar.reshape(()).astype(jnp.float32)
    wh_s = wh_t * s
    bh_s = bh * s
    wi_s = wi_diag * s

    # Lane-pad hidden and output dims to 128 so every vreg / MXU pass / store is
    # lane-dense.  Zero pads are inert: padded wh rows & cols, bh, wi, wo rows are 0,
    # so padded lanes of u stay tanh(0)=0 and contribute nothing to real outputs.
    Hp = _round_up(H, 128)
    Dp = _round_up(D_out, 128)
    wh_s = jnp.pad(wh_s, ((0, Hp - H), (0, Hp - H)))
    bh_s = jnp.pad(bh_s, ((0, 0), (0, Hp - H)))
    wi_s = jnp.pad(wi_s, ((0, 0), (0, Hp - H)))
    wo_p = jnp.pad(wo_t, ((0, Hp - H), (0, Dp - D_out)))
    bo_p = jnp.pad(bo, ((0, 0), (0, Dp - D_out)))

    # Grid-invariant step-0 term: u0 = -ones  =>  u0 @ Wh^T = -colsum(wh_s).
    # Computed once here instead of per batch tile inside the kernel.
    h0 = -jnp.sum(wh_s, axis=0, keepdims=True)        # (1, Hp)

    # Batch tiling: sublane-aligned; if the whole batch would be a single program,
    # split it in two so both v7x TensorCores get work under "parallel" semantics.
    TB = min(batch_tile, _round_up(B, 8))
    if _round_up(B, TB) == TB and TB >= 16:
        TB = _round_up(_cdiv(TB, 2), 8)
    B_pad = _round_up(B, TB)
    x = jnp.pad(x.astype(jnp.float32), ((0, B_pad - B), (0, Hp - D_in)))

    # 2-way sub-tile interleave needs two sublane-aligned halves.
    interleave = (TB % 16 == 0)

    kernel = functools.partial(
        _recurrent_scaled_grid_kernel,
        num_layers=num_layers, interleave=interleave, mxu_dtype=mxu_dtype)

    resident = lambda i: (0, 0)   # weights stay VMEM-resident across the batch grid

    # Explicit VMEM budget (with headroom) so large H / TB don't silently exceed the
    # scoped default; capped at v7x's 64 MiB physical per-TC VMEM.
    # TODO(synk): for large H, single-buffer the constant weight specs
    # (pipeline_mode=pl.Buffered(1)) and/or use the 5-point-stencil pltpu.roll
    # formulation of the masked Wh instead of the dense Hp x Hp matmul.
    itemsize = 4
    vmem_est = itemsize * (
        2 * TB * (Hp + Dp)                                 # x / out tiles (double-buffered)
        + 2 * (Hp * Hp + 3 * Hp + Hp * Dp + Dp)            # resident constants
        + 6 * TB * Hp                                      # live intermediates
    )
    vmem_limit = int(min(max(2 * vmem_est, 8 << 20), 64 << 20))

    out = pl.pallas_call(
        kernel,
        out_shape=jax.ShapeDtypeStruct((B_pad, Dp), jnp.float32),
        grid_spec=pltpu.PrefetchScalarGridSpec(
            num_scalar_prefetch=0,
            grid=(B_pad // TB,),
            in_specs=[
                pl.BlockSpec((TB, Hp), lambda i: (i, 0)),   # x tile
                pl.BlockSpec((Hp, Hp), resident),           # wh_s
                pl.BlockSpec((1, Hp), resident),            # wi_s (diag)
                pl.BlockSpec((1, Hp), resident),            # bh_s
                pl.BlockSpec((1, Hp), resident),            # h0
                pl.BlockSpec((Hp, Dp), resident),           # wo_p
                pl.BlockSpec((1, Dp), resident),            # bo_p
            ],
            out_specs=pl.BlockSpec((TB, Dp), lambda i: (i, 0)),
        ),
        compiler_params=pltpu.CompilerParams(
            dimension_semantics=("parallel",),
            vmem_limit_bytes=vmem_limit),
    )(x, wh_s, wi_s, bh_s, h0, wo_p, bo_p)

    return out[:B, :D_out]


def generate_grid_weight_mask(image_size):
    # TODO(synk): generateGridWeightMask is not defined in the provided source; a
    # 4-neighbour grid adjacency (+self) weightMask and an identity diagMask are
    # synthesized here.  The diagonal-Wi kernel path assumes diagMask == identity
    # (true for this synthesized mask); verify against the real mask before reuse.
    H = image_size * image_size
    idx = jnp.arange(H)
    row = idx // image_size
    col = idx % image_size
    manhattan = (jnp.abs(row[:, None] - row[None, :])
                 + jnp.abs(col[:, None] - col[None, :]))
    weight_mask = (manhattan <= 1).astype(jnp.float32)   # self + 4 grid neighbours
    diag_mask = jnp.eye(H, dtype=jnp.float32)
    return weight_mask, diag_mask


def init_params(key, image_size, layers):
    """Deterministic init mimicking nn.Linear defaults + the grid weight masks."""
    H = image_size * image_size
    D_in = H                 # diagMask is (H, H) and indexes inputWeight -> D_in == H
    D_out = 2                # RecurrentScaledGrid.outputLayer = nn.Linear(H, 2)
    wmask, dmask = generate_grid_weight_mask(image_size)

    keys = jax.random.split(key, 5)
    s_h = 1.0 / jnp.sqrt(H)
    s_in = 1.0 / jnp.sqrt(D_in)

    # hiddenWeight: (H, H) + bias, masked by weightMask (invertMask entries zeroed).
    wh = jax.random.uniform(keys[0], (H, H), jnp.float32, -s_h, s_h) * wmask
    bh = jax.random.uniform(keys[1], (H,), jnp.float32, -s_h, s_h)
    # inputWeight: (H, D_in), no bias, masked by diagMask (== identity here).
    wi = jax.random.uniform(keys[2], (H, D_in), jnp.float32, -s_in, s_in) * dmask
    # outputLayer: (D_out, H) + bias.
    wo = jax.random.uniform(keys[3], (D_out, H), jnp.float32, -s_h, s_h)
    bo = jax.random.uniform(keys[4], (D_out,), jnp.float32, -s_h, s_h)

    return {
        "wh_t": wh.T,                                   # (H, H)
        "bh": bh.reshape(1, H),                         # (1, H)
        "wi_t": wi.T,                                   # (D_in, H) dense, for reference
        "wi_diag": jnp.diagonal(wi).reshape(1, H),      # (1, H)  kernel fast path
        "scalar": jnp.full((1, 1), 5.0, jnp.float32),   # nn.Parameter(ones(1) * 5)
        "wo_t": wo.T,                                   # (H, D_out)
        "bo": bo.reshape(1, D_out),                     # (1, D_out)
        "layers": layers,
    }


def recurrent_scaled_grid_reference(x, params):
    """Pure-JAX reference of the same forward (dense Wi, scalar applied per step)."""
    wh_t = params["wh_t"]
    bh = params["bh"][0]
    wi_t = params["wi_t"]
    s = params["scalar"][0, 0]
    wo_t = params["wo_t"]
    bo = params["bo"][0]
    H = wh_t.shape[0]

    u = -jnp.ones((H,), jnp.float32)        # Variable(-1 * torch.ones(H))
    for _ in range(int(params["layers"])):
        v = u @ wh_t + bh + x @ wi_t
        u = jnp.tanh(v * s)
    return jnp.maximum(u @ wo_t + bo, 0.0)  # relu(outputLayer(u))


if __name__ == "__main__":
    # Small shapes consistent with the module: imageSize x imageSize grid of pixels.
    image_size = 8
    H = image_size * image_size   # 64
    layers = 3

    key = jax.random.PRNGKey(0)
    k_x1, k_x2, k_p = jax.random.split(key, 3)
    params = init_params(k_p, image_size, layers)

    # Case 1: tiny batch (single grid program, no interleave).
    x1 = jax.random.normal(k_x1, (2, H), dtype=jnp.float32)
    y1 = jax.block_until_ready(recurrent_scaled_grid_forward(x1, params))
    y1_ref = recurrent_scaled_grid_reference(x1, params)
    assert y1.shape == (2, 2)
    assert jnp.allclose(y1, y1_ref, atol=1e-4, rtol=1e-4), "mismatch (case 1)"

    # Case 2: batch exercising the grid, batch padding and the 2-way interleave.
    x2 = jax.random.normal(k_x2, (40, H), dtype=jnp.float32)
    y2 = jax.block_until_ready(
        recurrent_scaled_grid_forward(x2, params, batch_tile=16))
    y2_ref = recurrent_scaled_grid_reference(x2, params)
    assert y2.shape == (40, 2)
    assert jnp.allclose(y2, y2_ref, atol=1e-4, rtol=1e-4), "mismatch (case 2)"

    # Case 3: bf16 MXU-operand fast path (v6e/v7x), relaxed tolerance.
    y3 = jax.block_until_ready(
        recurrent_scaled_grid_forward(x2, params, batch_tile=16,
                                      mxu_dtype=jnp.bfloat16))
    assert jnp.all(jnp.isfinite(y3))
    assert jnp.allclose(y3, y2_ref, atol=5e-2, rtol=5e-2), "mismatch (bf16 path)"

    print("KERNEL_OK")
</pallas_src>

<mosaic_0001>
module attributes {stable_mosaic.version = 11 : i64} {
  func.func @_recurrent_scaled_grid_kernel(%arg0: i32, %arg1: memref<8x128xf32, #tpu.memory_space<vmem>>, %arg2: memref<128x128xf32, #tpu.memory_space<vmem>>, %arg3: memref<1x128xf32, #tpu.memory_space<vmem>>, %arg4: memref<1x128xf32, #tpu.memory_space<vmem>>, %arg5: memref<1x128xf32, #tpu.memory_space<vmem>>, %arg6: memref<128x128xf32, #tpu.memory_space<vmem>>, %arg7: memref<1x128xf32, #tpu.memory_space<vmem>>, %arg8: memref<8x128xf32, #tpu.memory_space<vmem>>) attributes {dimension_semantics = [#tpu.dimension_semantics<parallel>], iteration_bounds = array<i64: 1>, scalar_prefetch = 0 : i64, scratch_operands = 0 : i64, tpu.core_type = #tpu.core_type<tc>, window_params = [{transform_indices = @transform_0, window_bounds = array<i64: 8, 128>}, {pipeline_mode = #tpu.pipeline_mode<synchronous>, transform_indices = @transform_1, window_bounds = array<i64: 128, 128>}, {pipeline_mode = #tpu.pipeline_mode<synchronous>, transform_indices = @transform_2, window_bounds = array<i64: 1, 128>}, {pipeline_mode = #tpu.pipeline_mode<synchronous>, transform_indices = @transform_3, window_bounds = array<i64: 1, 128>}, {pipeline_mode = #tpu.pipeline_mode<synchronous>, transform_indices = @transform_4, window_bounds = array<i64: 1, 128>}, {pipeline_mode = #tpu.pipeline_mode<synchronous>, transform_indices = @transform_5, window_bounds = array<i64: 128, 128>}, {pipeline_mode = #tpu.pipeline_mode<synchronous>, transform_indices = @transform_6, window_bounds = array<i64: 1, 128>}, {transform_indices = @transform_7, window_bounds = array<i64: 8, 128>}]} {
    %c0 = arith.constant 0 : index
    %c0_0 = arith.constant 0 : index
    %0 = vector.load %arg1[%c0, %c0_0] : memref<8x128xf32, #tpu.memory_space<vmem>>, vector<8x128xf32>
    %c0_1 = arith.constant 0 : index
    %c0_2 = arith.constant 0 : index
    %1 = vector.load %arg2[%c0_1, %c0_2] : memref<128x128xf32, #tpu.memory_space<vmem>>, vector<128x128xf32>
    %c0_3 = arith.constant 0 : index
    %c0_4 = arith.constant 0 : index
    %2 = vector.load %arg3[%c0_3, %c0_4] : memref<1x128xf32, #tpu.memory_space<vmem>>, vector<1x128xf32>
    %3 = vector.broadcast %2 : vector<1x128xf32> to vector<8x128xf32>
    %4 = arith.mulf %0, %3 : vector<8x128xf32>
    %c0_5 = arith.constant 0 : index
    %c0_6 = arith.constant 0 : index
    %5 = vector.load %arg4[%c0_5, %c0_6] : memref<1x128xf32, #tpu.memory_space<vmem>>, vector<1x128xf32>
    %6 = vector.broadcast %5 : vector<1x128xf32> to vector<8x128xf32>
    %7 = arith.addf %4, %6 : vector<8x128xf32>
    %c0_7 = arith.constant 0 : index
    %c0_8 = arith.constant 0 : index
    %8 = vector.load %arg5[%c0_7, %c0_8] : memref<1x128xf32, #tpu.memory_space<vmem>>, vector<1x128xf32>
    %9 = vector.broadcast %8 : vector<1x128xf32> to vector<8x128xf32>
    %10 = arith.addf %9, %7 : vector<8x128xf32>
    %11 = math.tanh %10 : vector<8x128xf32>
    %cst = arith.constant dense<0.000000e+00> : vector<8x128xf32>
    %12 = tpu.matmul %11, %1, %cst {dimension_numbers = #tpu.dot_dimension_numbers<[1], [0], [0], [1], [0, 0, 1, 1], [], []>} : vector<8x128xf32>, vector<128x128xf32>, vector<8x128xf32> -> vector<8x128xf32>
    %13 = arith.addf %12, %7 : vector<8x128xf32>
    %14 = math.tanh %13 : vector<8x128xf32>
    %cst_9 = arith.constant dense<0.000000e+00> : vector<8x128xf32>
    %15 = tpu.matmul %14, %1, %cst_9 {dimension_numbers = #tpu.dot_dimension_numbers<[1], [0], [0], [1], [0, 0, 1, 1], [], []>} : vector<8x128xf32>, vector<128x128xf32>, vector<8x128xf32> -> vector<8x128xf32>
    %16 = arith.addf %15, %7 : vector<8x128xf32>
    %17 = math.tanh %16 : vector<8x128xf32>
    %c0_10 = arith.constant 0 : index
    %c0_11 = arith.constant 0 : index
    %18 = vector.load %arg6[%c0_10, %c0_11] : memref<128x128xf32, #tpu.memory_space<vmem>>, vector<128x128xf32>
    %cst_12 = arith.constant dense<0.000000e+00> : vector<8x128xf32>
    %19 = tpu.matmul %17, %18, %cst_12 {dimension_numbers = #tpu.dot_dimension_numbers<[1], [0], [0], [1], [0, 0, 1, 1], [], []>} : vector<8x128xf32>, vector<128x128xf32>, vector<8x128xf32> -> vector<8x128xf32>
    %c0_13 = arith.constant 0 : index
    %c0_14 = arith.constant 0 : index
    %20 = vector.load %arg7[%c0_13, %c0_14] : memref<1x128xf32, #tpu.memory_space<vmem>>, vector<1x128xf32>
    %21 = vector.broadcast %20 : vector<1x128xf32> to vector<8x128xf32>
    %22 = arith.addf %19, %21 : vector<8x128xf32>
    %cst_15 = arith.constant 0.000000e+00 : f32
    %23 = vector.broadcast %cst_15 : f32 to vector<8x128xf32>
    %24 = arith.maximumf %22, %23 : vector<8x128xf32>
    %c0_16 = arith.constant 0 : index
    %c0_17 = arith.constant 0 : index
    %25 = vector.load %arg8[%c0_16, %c0_17] : memref<8x128xf32, #tpu.memory_space<vmem>>, vector<8x128xf32>
    tpu.vector_store %arg8[%c0_16, %c0_17], %24 {strides = array<i32>} : memref<8x128xf32, #tpu.memory_space<vmem>>, vector<8x128xf32>,
    return
  }
  func.func @transform_0(%arg0: i32) -> (i32, i32) {
    %c0_i32 = arith.constant 0 : i32
    %c0_i32_0 = arith.constant 0 : i32
    return %arg0, %c0_i32 : i32, i32
  }
  func.func @transform_1(%arg0: i32) -> (i32, i32) {
    %c0_i32 = arith.constant 0 : i32
    %c0_i32_0 = arith.constant 0 : i32
    %c0_i32_1 = arith.constant 0 : i32
    return %c0_i32, %c0_i32_0 : i32, i32
  }
  func.func @transform_2(%arg0: i32) -> (i32, i32) {
    %c0_i32 = arith.constant 0 : i32
    %c0_i32_0 = arith.constant 0 : i32
    %c0_i32_1 = arith.constant 0 : i32
    return %c0_i32, %c0_i32_0 : i32, i32
  }
  func.func @transform_3(%arg0: i32) -> (i32, i32) {
    %c0_i32 = arith.constant 0 : i32
    %c0_i32_0 = arith.constant 0 : i32
    %c0_i32_1 = arith.constant 0 : i32
    return %c0_i32, %c0_i32_0 : i32, i32
  }
  func.func @transform_4(%arg0: i32) -> (i32, i32) {
    %c0_i32 = arith.constant 0 : i32
    %c0_i32_0 = arith.constant 0 : i32
    %c0_i32_1 = arith.constant 0 : i32
    return %c0_i32, %c0_i32_0 : i32, i32
  }
  func.func @transform_5(%arg0: i32) -> (i32, i32) {
    %c0_i32 = arith.constant 0 : i32
    %c0_i32_0 = arith.constant 0 : i32
    %c0_i32_1 = arith.constant 0 : i32
    return %c0_i32, %c0_i32_0 : i32, i32
  }
  func.func @transform_6(%arg0: i32) -> (i32, i32) {
    %c0_i32 = arith.constant 0 : i32
    %c0_i32_0 = arith.constant 0 : i32
    %c0_i32_1 = arith.constant 0 : i32
    return %c0_i32, %c0_i32_0 : i32, i32
  }
  func.func @transform_7(%arg0: i32) -> (i32, i32) {
    %c0_i32 = arith.constant 0 : i32
    %c0_i32_0 = arith.constant 0 : i32
    return %arg0, %c0_i32 : i32, i32
  }
}

</mosaic_0001>

<bundles_post_ra>
// kernel: tpu_custom_call.1
= control target key start
LH: loop header
LB: loop body
LE: loop exit
PB: predicated region body
PF: predicated region fallthrough
CT: control target
= control target key end

     0   :  { %12 = vsyncpa [#allocation3], 0  ;;  %s400_s0 = inlined_call_operand.hbm [shape: f32[8,128], index: 0, kind: input, shape index: {}]   ;;  %s401_s1 = inlined_call_operand.hbm [shape: f32[128,128], index: 1, kind: input, shape index: {}]   ;;  %s402_s2 = inlined_call_operand.vmem [shape: f32[1,128], index: 2, kind: input, shape index: {}]   ;;  %s403_s3 = inlined_call_operand.vmem [shape: f32[1,128], index: 3, kind: input, shape index: {}]   ;;  %s404_s4 = inlined_call_operand.vmem [shape: f32[1,128], index: 4, kind: input, shape index: {}]   ;;  %s405_s5 = inlined_call_operand.hbm [shape: f32[128,128], index: 5, kind: input, shape index: {}]   ;;  %s406_s6 = inlined_call_operand.vmem [shape: f32[1,128], index: 6, kind: input, shape index: {}]   ;;  %s407_s7 = inlined_call_operand.hbm [shape: f32[8,128], index: 7, kind: output, shape index: {}]  }
   0x1   :  { %13 = vsyncpa [#allocation6], 0  ;;  %s30_s26 = sshll.u32 %s401_s1, 4  ;;  %s31_s26 = int_to_ptr.hbm [resolvable:$true] %s30_s26 }
   0x2   :  { %14 = vsyncpa [#allocation4], 0  ;;  %s325_s27 = smov [#allocation5]   ;;  %s20_s8 = sshll.u32 %s400_s0, 4  ;;  %s21_s8 = int_to_ptr.hbm [resolvable:$true] %s20_s8 }
   0x3   :  { %s32_s28 = sshll.u32 %s325_s27, 4  ;;  %s326_s9 = smov 128   ;;  %s33_s28 = int_to_ptr.vmem [resolvable:$true] %s32_s28 }
   0x4   :  { %s327_s10 = smov 8   ;;  %s328_s11 = smov [#allocation2]  }
   0x5   :  { %38 = dma.hbm_to_vmem [thread:$0]  %s31_s26, 2048, %s33_s28, [#allocation6], %s326_s9, %s326_s9, %s327_s10  }
   0x6   :  { %s22_s12 = sshll.u32 %s328_s11, 4  ;;  %s49_s15 = sshll.u32 %s405_s5, 4  ;;  %s23_s12 = int_to_ptr.vmem [resolvable:$true] %s22_s12  ;;  %s50_s15 = int_to_ptr.hbm [resolvable:$true] %s49_s15 }
   0x7   :  { %25 = dma.hbm_to_vmem [thread:$0]  %s21_s8, 128, %s23_s12, [#allocation3]  }
   0x8   :  { %s329_s1 = smov [#allocation7]  }
   0x9   :  { %s51_s16 = sshll.u32 %s329_s1, 4  ;;  %s52_s16 = int_to_ptr.vmem [resolvable:$true] %s51_s16 }
   0xa   :  { %57 = dma.hbm_to_vmem [thread:$0]  %s50_s15, 2048, %s52_s16, [#allocation6], %s326_s9, %s326_s9, %s327_s10  }
   0xb   :  { %319 = dma.done.wait [#allocation3], 128  }
   0xc   :  { %320 = vsyncadd [#allocation3], 4294967168 }
   0xd   :  { %321 = dma.done.wait [#allocation6], 4096  }
   0xe   :  { %322 = vsyncadd [#allocation6], 4294963200  ;;  %v88_v0 = vld [vmem:[#allocation5 + $0x78] sm:$0xff]  ;;  %v87_v1 = vld [vmem:[#allocation5 + $0x70] sm:$0xff]  ;;  %s330_s20 = smov [#allocation8]   ;;  %s196_s24 = sshll.u32 %s407_s7, 4  ;;  %s197_s24 = int_to_ptr.hbm [resolvable:$true] %s196_s24 }
   0xf   :  { %105 = vmatpush.msra.mxu0 %v88_v0  ;;  %126 = vmatpush.msra.mxu1 %v88_v0  ;;  %v86_v2 = vld [vmem:[#allocation5 + $0x68] sm:$0xff]  ;;  %v85_v3 = vld [vmem:[#allocation5 + $0x60] sm:$0xff]  ;;  %v84_v4 = vld [vmem:[#allocation5 + $0x58] sm:$0xff]  ;;  %s194_s21 = sshll.u32 %s330_s20, 4  ;;  %s195_s21 = int_to_ptr.vmem [resolvable:$true] %s194_s21 }
  0x10   :  { %v213_v5 = vld [vmem:[%s402_s2] ss:$0 sm:$0xff]  ;;  %v83_v6 = vld [vmem:[#allocation5 + $0x50] sm:$0xff]  ;;  %v82_v8 = vld [vmem:[#allocation5 + $0x48] sm:$0xff] }
  0x11   :  { %106 = vmatpush.msra.mxu0 %v87_v1  ;;  %127 = vmatpush.msra.mxu1 %v87_v1  ;;  %v72_v7 = vld [vmem:[#allocation2] sm:$0xff]  ;;  %v81_v11 = vld [vmem:[#allocation5 + $0x40] sm:$0xff]  ;;  %v79_v15 = vld [vmem:[#allocation5 + $0x30] sm:$0xff] }
  0x12   :  { %v93_v9 = vmul.f32 %v213_v5, %v72_v7  ;;  %v214_v10 = vld [vmem:[%s403_s3] ss:$0 sm:$0xff]  ;;  %v78_v16 = vld [vmem:[#allocation5 + $0x28] sm:$0xff]  ;;  %v77_v18 = vld [vmem:[#allocation5 + $0x20] sm:$0xff] }
  0x13   :  { %107 = vmatpush.msra.mxu0 %v86_v2  ;;  %128 = vmatpush.msra.mxu1 %v86_v2  ;;  %v80_v12 = vld [vmem:[#allocation5 + $0x38] sm:$0xff]  ;;  %v75_v20 = vld [vmem:[#allocation5 + $0x10] sm:$0xff]  ;;  %v74_v21 = vld [vmem:[#allocation5 + $0x8] sm:$0xff] }
  0x14   :  { %v386_v13 = vadd.f32 %v214_v10, %v93_v9  ;;  %v215_v14 = vld [vmem:[%s404_s4] ss:$0 sm:$0xff]  ;;  %v73_v22 = vld [vmem:[#allocation5] sm:$0xff]  ;;  %v161_v25 = vld [vmem:[#allocation7 + $0x70] sm:$0xff] }
  0x15   :  { %108 = vmatpush.msra.mxu0 %v85_v3  ;;  %129 = vmatpush.msra.mxu1 %v85_v3  ;;  %v76_v19 = vld [vmem:[#allocation5 + $0x18] sm:$0xff]  ;;  %v160_v26 = vld [vmem:[#allocation7 + $0x68] sm:$0xff]  ;;  %v159_v27 = vld [vmem:[#allocation7 + $0x60] sm:$0xff] }
  0x16   :  { %v103_v17 = vadd.f32 %v215_v14, %v386_v13  ;;  %v162_v24 = vld [vmem:[#allocation7 + $0x78] sm:$0xff]  ;;  %v157_v29 = vld [vmem:[#allocation7 + $0x50] sm:$0xff]  ;;  %v156_v30 = vld [vmem:[#allocation7 + $0x48] sm:$0xff] }
  0x17   :  { %109 = vmatpush.msra.mxu0 %v84_v4  ;;  %130 = vmatpush.msra.mxu1 %v84_v4  ;;  %v158_v28 = vld [vmem:[#allocation7 + $0x58] sm:$0xff]  ;;  %v155_v31 = vld [vmem:[#allocation7 + $0x40] sm:$0xff]  ;;  %v153_v33 = vld [vmem:[#allocation7 + $0x30] sm:$0xff] }
  0x18   :  { %217 = vtanh.f32 %v103_v17  ;;  %167 = vmatpush.msra.mxu2 %v162_v24  ;;  %v154_v32 = vld [vmem:[#allocation7 + $0x38] sm:$0xff]  ;;  %v152_v34 = vld [vmem:[#allocation7 + $0x28] sm:$0xff]  ;;  %v151_v38 = vld [vmem:[#allocation7 + $0x20] sm:$0xff] }
  0x19   :  { %110 = vmatpush.msra.mxu0 %v83_v6  ;;  %131 = vmatpush.msra.mxu1 %v83_v6  ;;  %v150_v39 = vld [vmem:[#allocation7 + $0x18] sm:$0xff]  ;;  %v149_v40 = vld [vmem:[#allocation7 + $0x10] sm:$0xff]  ;;  %v148_v41 = vld [vmem:[#allocation7 + $0x8] sm:$0xff] }
  0x1a   :  { %168 = vmatpush.msra.mxu2 %v161_v25  ;;  %v147_v42 = vld [vmem:[#allocation7] sm:$0xff]  ;;  %v216_v46 = vld [vmem:[%s406_s6] ss:$0 sm:$0xff] }
  0x1b   :  { %111 = vmatpush.msra.mxu0 %v82_v8  ;;  %132 = vmatpush.msra.mxu1 %v82_v8 }
  0x1c   :  { %169 = vmatpush.msra.mxu2 %v160_v26 }
  0x1d   :  { %112 = vmatpush.msra.mxu0 %v81_v11  ;;  %133 = vmatpush.msra.mxu1 %v81_v11 }
  0x1e   :  { %v218_v23 = vpop.eup %217  ;;  %170 = vmatpush.msra.mxu2 %v159_v27 }
  0x1f   :  { %113 = vmatpush.msra.mxu0 %v80_v12  ;;  %134 = vmatpush.msra.mxu1 %v80_v12 }
  0x20   :  { %171 = vmatpush.msra.mxu2 %v158_v28 }
  0x21   :  { %114 = vmatpush.msra.mxu0 %v79_v15  ;;  %135 = vmatpush.msra.mxu1 %v79_v15 }
  0x22   :  { %172 = vmatpush.msra.mxu2 %v157_v29 }
  0x23   :  { %115 = vmatpush.msra.mxu0 %v78_v16  ;;  %136 = vmatpush.msra.mxu1 %v78_v16 }
  0x24   :  { %173 = vmatpush.msra.mxu2 %v156_v30 }
  0x25   :  { %116 = vmatpush.msra.mxu0 %v77_v18  ;;  %137 = vmatpush.msra.mxu1 %v77_v18 }
  0x26   :  { %174 = vmatpush.msra.mxu2 %v155_v31 }
  0x27   :  { %117 = vmatpush.msra.mxu0 %v76_v19  ;;  %138 = vmatpush.msra.mxu1 %v76_v19 }
  0x28   :  { %175 = vmatpush.msra.mxu2 %v154_v32 }
  0x29   :  { %118 = vmatpush.msra.mxu0 %v75_v20  ;;  %139 = vmatpush.msra.mxu1 %v75_v20 }
  0x2a   :  { %176 = vmatpush.msra.mxu2 %v153_v33 }
  0x2b   :  { %119 = vmatpush.msra.mxu0 %v74_v21  ;;  %140 = vmatpush.msra.mxu1 %v74_v21 }
  0x2c   :  { %177 = vmatpush.msra.mxu2 %v152_v34 }
  0x2d   :  { %120 = vmatpush.msra.mxu0 %v73_v22  ;;  %141 = vmatpush.msra.mxu1 %v73_v22 }
  0x2e   :  { %121 = vmatmul.f32.vlgmr.msra.gmra.mxu0 %v218_v23  ;;  %178 = vmatpush.msra.mxu2 %v151_v38 }
  0x30   :  { %179 = vmatpush.msra.mxu2 %v150_v39 }
  0x32   :  { %180 = vmatpush.msra.mxu2 %v149_v40 }
  0x34   :  { %181 = vmatpush.msra.mxu2 %v148_v41 }
  0x36   :  { %182 = vmatpush.msra.mxu2 %v147_v42 }
  0xab   :  { %v122_v35 = vpop.f32.mrf.mxu0 }
  0xac   :  { %v123_v36 = vadd.f32 %v122_v35, %v386_v13 }
  0xae   :  { %219 = vtanh.f32 %v123_v36 }
  0xb4   :  { %v220_v37 = vpop.eup %219 }
  0xb5   :  { %142 = vmatmul.f32.vlgmr.msra.gmra.mxu1 %v220_v37 }
 0x132   :  { %v143_v43 = vpop.f32.mrf.mxu1 }
 0x133   :  { %v144_v44 = vadd.f32 %v143_v43, %v386_v13 }
 0x135   :  { %221 = vtanh.f32 %v144_v44 }
 0x13b   :  { %v222_v45 = vpop.eup %221 }
 0x13c   :  { %183 = vmatmul.f32.vlgmr.msra.gmra.mxu2 %v222_v45 }
 0x1bf   :  { %v184_v47 = vpop.f32.mrf.mxu2 }
 0x1c0   :  { %v185_v48 = vadd.f32 %v216_v46, %v184_v47 }
 0x1c2   :  { %v187_v49 = vmax.f32 %v185_v48, 0.0 }
 0x1c4   :  { %188 = vst [vmem:[#allocation8] sm:$0xff] %v187_v49 }
 0x1c5   :  { %199 = dma.vmem_to_hbm [thread:$0]  %s195_s21, 128, %s197_s24, [#allocation4]  }
 0x1c6   :  { %323 = dma.done.wait [#allocation4], 128  }
 0x1c7   :  { %324 = vsyncadd [#allocation4], 4294967168 }
 0x1c8   :  { %204 = vsyncpa [#allocation3], 1 }
 0x1c9   :  { %205 = vsyncpa [#allocation6], 1 }
 0x1ca   :  { %206 = vsyncpa [#allocation4], 1 }

</bundles_post_ra>
